<compile_context>
chip_gen: v5e
topology: v5e:2x2
jax: 0.10.0
libtpu: 0.0.40
codegen_flags: <defaults>
</compile_context>

<pallas_src>
import math

import jax
import jax.numpy as jnp
from jax import lax
from jax.experimental import pallas as pl
from jax.experimental.pallas import tpu as pltpu


def _round_up(x, m):
    return ((x + m - 1) // m) * m


def split_bias_linear_kernel(x_ref, w_ref, b_ref, o_ref, acc_ref):
    """Computes one (tm, tn) output tile; K is the innermost reduction axis."""
    @pl.when(pl.program_id(2) == 0)
    def _():
        acc_ref[...] = jnp.zeros_like(acc_ref)

    # x block: [tm, tk]; w block: [tn, tk] (PyTorch [D_out, D_in] layout kept
    # as-is). Contract the K axis of both — no wrapper transpose needed.
    acc_ref[...] += lax.dot_general(
        x_ref[...], w_ref[...],
        dimension_numbers=(((1,), (1,)), ((), ())),
        preferred_element_type=jnp.float32)

    @pl.when(pl.program_id(2) == pl.num_programs(2) - 1)
    def _():
        o_ref[...] = (acc_ref[...] + b_ref[...].astype(jnp.float32)
                      ).astype(o_ref.dtype)


def split_bias_linear(x, weight, bias_pos, bias_neg,
                      *, tm_max=128, tn_max=256, tk_max=512):
    """SplitBias(nn.Linear) forward.

    x:        [B, D_in]
    weight:   [D_out, D_in]  (PyTorch convention, NOT transposed here)
    bias_pos: [D_out]
    bias_neg: [D_out]
    returns:  [B, D_out]
    """
    B, D_in = x.shape
    D_out = weight.shape[0]

    # Fold the bias split-sum once (static per call) -> single bias stream.
    bias = (bias_pos + bias_neg).reshape(1, D_out)

    # Tile sizes: (8,128)-aligned, shrink for tiny problems, capped so the
    # double-buffered footprint stays small (safe on v5e/v6e/v7x VMEM).
    tm = min(tm_max, _round_up(B, 8))
    tn = min(tn_max, _round_up(D_out, 128))
    tk = min(tk_max, _round_up(D_in, 128))

    # Pad to tile multiples. N is padded to >=128 so output stores are
    # lane-dense. Zero padding is exact: padded K columns contribute 0, padded
    # M/N rows/cols are sliced off below.
    M = _round_up(B, tm)
    N = _round_up(D_out, tn)
    K = _round_up(D_in, tk)
    # TODO(synk): in a real model, store weight/bias pre-padded (and optionally
    # pre-cast to bf16 for v6e/v7x MXU peak) at init so this pad is not
    # re-done every forward call.
    if (M, K) != (B, D_in):
        x = jnp.pad(x, ((0, M - B), (0, K - D_in)))
    if (N, K) != (D_out, D_in):
        weight = jnp.pad(weight, ((0, N - D_out), (0, K - D_in)))
    if N != D_out:
        bias = jnp.pad(bias, ((0, 0), (0, N - D_out)))

    grid = (M // tm, N // tn, K // tk)
    itemsize = x.dtype.itemsize
    cost = pl.CostEstimate(
        flops=2 * M * N * K,
        transcendentals=0,
        bytes_accessed=(M * K + N * K + M * N) * itemsize
                       + N * bias.dtype.itemsize)

    out = pl.pallas_call(
        split_bias_linear_kernel,
        out_shape=jax.ShapeDtypeStruct((M, N), x.dtype),
        grid_spec=pltpu.PrefetchScalarGridSpec(
            num_scalar_prefetch=0,
            grid=grid,
            in_specs=[
                pl.BlockSpec((tm, tk), lambda i, j, k: (i, k)),   # x
                pl.BlockSpec((tn, tk), lambda i, j, k: (j, k)),   # weight (untransposed)
                pl.BlockSpec((1, tn), lambda i, j, k: (0, j)),    # bias (resident over K)
            ],
            out_specs=pl.BlockSpec((tm, tn), lambda i, j, k: (i, j)),
            scratch_shapes=[pltpu.VMEM((tm, tn), jnp.float32)],
        ),
        compiler_params=pltpu.CompilerParams(
            # M/N parallel -> grid shards across v7x's 2 TensorCores; harmless
            # (serial loop) on single-TC v5e/v6e. K is the reduction axis.
            dimension_semantics=("parallel", "parallel", "arbitrary")),
        cost_estimate=cost,
    )(x, weight, bias)

    return out[:B, :D_out]


if __name__ == "__main__":
    # Small shapes: batch=8, in_features=32, out_features=32.
    B, D_in, D_out = 8, 32, 32
    key = jax.random.PRNGKey(0)
    kx, kw, kbp, kbn = jax.random.split(key, 4)

    # Deterministic parameter init mirroring the module's reset_parameters:
    #   weight: nn.Linear default -> U(-1/sqrt(fan_in), 1/sqrt(fan_in))
    #   bias_pos ~ U(0, sqrt(2)/sqrt(fan_in)), bias_neg ~ U(-sqrt(2)/sqrt(fan_in), 0)
    fan_in = D_in
    bound = 1.0 / math.sqrt(fan_in)
    weight = jax.random.uniform(kw, (D_out, D_in), jnp.float32,
                                minval=-bound, maxval=bound)
    bias_pos = jax.random.uniform(kbp, (D_out,), jnp.float32,
                                  minval=0.0, maxval=math.sqrt(2) * bound)
    bias_neg = jax.random.uniform(kbn, (D_out,), jnp.float32,
                                  minval=-math.sqrt(2) * bound, maxval=0.0)
    x = jax.random.normal(kx, (B, D_in), jnp.float32)

    y = split_bias_linear(x, weight, bias_pos, bias_neg)
    y = jax.block_until_ready(y)

    # Reference check (plain JAX) for the forward semantics.
    y_ref = x @ weight.T + (bias_pos + bias_neg)[None, :]
    assert y.shape == (B, D_out)
    assert jnp.allclose(y, y_ref, atol=1e-5, rtol=1e-5)

    print("KERNEL_OK")
</pallas_src>

<mosaic_0001>
module attributes {stable_mosaic.version = 11 : i64} {
  func.func @split_bias_linear_kernel(%arg0: i32, %arg1: i32, %arg2: i32, %arg3: memref<8x128xf32, #tpu.memory_space<vmem>>, %arg4: memref<128x128xf32, #tpu.memory_space<vmem>>, %arg5: memref<1x128xf32, #tpu.memory_space<vmem>>, %arg6: memref<8x128xf32, #tpu.memory_space<vmem>>, %arg7: memref<8x128xf32, #tpu.memory_space<vmem>>) attributes {dimension_semantics = [#tpu.dimension_semantics<parallel>, #tpu.dimension_semantics<parallel>, #tpu.dimension_semantics<arbitrary>], iteration_bounds = array<i64: 1, 1, 1>, scalar_prefetch = 0 : i64, scratch_operands = 1 : i64, tpu.core_type = #tpu.core_type<tc>, window_params = [{transform_indices = @transform_0, window_bounds = array<i64: 8, 128>}, {transform_indices = @transform_1, window_bounds = array<i64: 128, 128>}, {transform_indices = @transform_2, window_bounds = array<i64: 1, 128>}, {transform_indices = @transform_3, window_bounds = array<i64: 8, 128>}]} {
    %c0_i32 = arith.constant 0 : i32
    %0 = arith.cmpi eq, %arg2, %c0_i32 : i32
    %1 = arith.extui %0 : i1 to i32
    %c0_i32_0 = arith.constant 0 : i32
    %2 = arith.cmpi ne, %1, %c0_i32_0 : i32
    scf.if %2 {
      %cst_10 = arith.constant 0.000000e+00 : f32
      %12 = vector.broadcast %cst_10 : f32 to vector<8x128xf32>
      %c0_11 = arith.constant 0 : index
      %c0_12 = arith.constant 0 : index
      %13 = vector.load %arg7[%c0_11, %c0_12] : memref<8x128xf32, #tpu.memory_space<vmem>>, vector<8x128xf32>
      tpu.vector_store %arg7[%c0_11, %c0_12], %12 {strides = array<i32>} : memref<8x128xf32, #tpu.memory_space<vmem>>, vector<8x128xf32>,
    } else {
    }
    %c0 = arith.constant 0 : index
    %c0_1 = arith.constant 0 : index
    %3 = vector.load %arg7[%c0, %c0_1] : memref<8x128xf32, #tpu.memory_space<vmem>>, vector<8x128xf32>
    %c0_2 = arith.constant 0 : index
    %c0_3 = arith.constant 0 : index
    %4 = vector.load %arg3[%c0_2, %c0_3] : memref<8x128xf32, #tpu.memory_space<vmem>>, vector<8x128xf32>
    %c0_4 = arith.constant 0 : index
    %c0_5 = arith.constant 0 : index
    %5 = vector.load %arg4[%c0_4, %c0_5] : memref<128x128xf32, #tpu.memory_space<vmem>>, vector<128x128xf32>
    %cst = arith.constant dense<0.000000e+00> : vector<8x128xf32>
    %6 = tpu.matmul %4, %5, %cst {dimension_numbers = #tpu.dot_dimension_numbers<[1], [1], [0], [0], [0, 0, 1, 0], [], []>} : vector<8x128xf32>, vector<128x128xf32>, vector<8x128xf32> -> vector<8x128xf32>
    %7 = arith.addf %3, %6 : vector<8x128xf32>
    %c0_6 = arith.constant 0 : index
    %c0_7 = arith.constant 0 : index
    %8 = vector.load %arg7[%c0_6, %c0_7] : memref<8x128xf32, #tpu.memory_space<vmem>>, vector<8x128xf32>
    tpu.vector_store %arg7[%c0_6, %c0_7], %7 {strides = array<i32>} : memref<8x128xf32, #tpu.memory_space<vmem>>, vector<8x128xf32>,
    %c0_i32_8 = arith.constant 0 : i32
    %9 = arith.cmpi eq, %arg2, %c0_i32_8 : i32
    %10 = arith.extui %9 : i1 to i32
    %c0_i32_9 = arith.constant 0 : i32
    %11 = arith.cmpi ne, %10, %c0_i32_9 : i32
    scf.if %11 {
      %c0_10 = arith.constant 0 : index
      %c0_11 = arith.constant 0 : index
      %12 = vector.load %arg7[%c0_10, %c0_11] : memref<8x128xf32, #tpu.memory_space<vmem>>, vector<8x128xf32>
      %c0_12 = arith.constant 0 : index
      %c0_13 = arith.constant 0 : index
      %13 = vector.load %arg5[%c0_12, %c0_13] : memref<1x128xf32, #tpu.memory_space<vmem>>, vector<1x128xf32>
      %14 = vector.broadcast %13 : vector<1x128xf32> to vector<8x128xf32>
      %15 = arith.addf %12, %14 : vector<8x128xf32>
      %c0_14 = arith.constant 0 : index
      %c0_15 = arith.constant 0 : index
      %16 = vector.load %arg6[%c0_14, %c0_15] : memref<8x128xf32, #tpu.memory_space<vmem>>, vector<8x128xf32>
      tpu.vector_store %arg6[%c0_14, %c0_15], %15 {strides = array<i32>} : memref<8x128xf32, #tpu.memory_space<vmem>>, vector<8x128xf32>,
    } else {
    }
    return
  }
  func.func @transform_0(%arg0: i32, %arg1: i32, %arg2: i32) -> (i32, i32) {
    %c0_i32 = arith.constant 0 : i32
    return %arg0, %arg2 : i32, i32
  }
  func.func @transform_1(%arg0: i32, %arg1: i32, %arg2: i32) -> (i32, i32) {
    %c0_i32 = arith.constant 0 : i32
    return %arg1, %arg2 : i32, i32
  }
  func.func @transform_2(%arg0: i32, %arg1: i32, %arg2: i32) -> (i32, i32) {
    %c0_i32 = arith.constant 0 : i32
    %c0_i32_0 = arith.constant 0 : i32
    return %c0_i32, %arg1 : i32, i32
  }
  func.func @transform_3(%arg0: i32, %arg1: i32, %arg2: i32) -> (i32, i32) {
    %c0_i32 = arith.constant 0 : i32
    return %arg0, %arg1 : i32, i32
  }
}

</mosaic_0001>

<bundles_post_ra>
// kernel: tpu_custom_call.1
= control target key start
LH: loop header
LB: loop body
LE: loop exit
PB: predicated region body
PF: predicated region fallthrough
CT: control target
= control target key end

     0   :  { %8 = vsyncpa [#allocation4], 0  ;;  %s239_s0 = inlined_call_operand.hbm [shape: f32[8,128], index: 0, kind: input, shape index: {}]   ;;  %s240_s1 = inlined_call_operand.hbm [shape: f32[128,128], index: 1, kind: input, shape index: {}]   ;;  %s241_s2 = inlined_call_operand.vmem [shape: f32[1,128], index: 2, kind: input, shape index: {}]   ;;  %s242_s3 = inlined_call_operand.hbm [shape: f32[8,128], index: 3, kind: output, shape index: {}]  }
   0x1   :  { %9 = vsyncpa [#allocation7], 0 }
   0x2   :  { %10 = vsyncpa [#allocation5], 0  ;;  %s16_s14 = sshll.u32 %s239_s0, 4  ;;  %s202_s15 = smov [#allocation3]   ;;  %s17_s14 = int_to_ptr.hbm [resolvable:$true] %s16_s14 }
   0x3   :  { %s18_s16 = sshll.u32 %s202_s15, 4  ;;  %s26_s19 = sshll.u32 %s240_s1, 4  ;;  %s19_s16 = int_to_ptr.vmem [resolvable:$true] %s18_s16  ;;  %s27_s19 = int_to_ptr.hbm [resolvable:$true] %s26_s19 }
   0x4   :  { %21 = dma.hbm_to_vmem [thread:$0]  %s17_s14, 128, %s19_s16, [#allocation4]  }
   0x5   :  { %s203_s20 = smov [#allocation6]   ;;  %s204_s22 = smov 128  }
   0x6   :  { %s28_s21 = sshll.u32 %s203_s20, 4  ;;  %s205_s23 = smov 8   ;;  %s29_s21 = int_to_ptr.vmem [resolvable:$true] %s28_s21 }
   0x7   :  { %34 = dma.hbm_to_vmem [thread:$0]  %s27_s19, 2048, %s29_s21, [#allocation7], %s204_s22, %s204_s22, %s205_s23  }
   0x8   :  { %196 = dma.done.wait [#allocation4], 128  }
   0x9   :  { %197 = vsyncadd [#allocation4], 4294967168 }
   0xa   :  { %198 = dma.done.wait [#allocation7], 2048  }
   0xb   :  { %199 = vsyncadd [#allocation7], 4294965248  ;;  %v67_v0 = vld [vmem:[#allocation6 + $0x78] sm:$0xff]  ;;  %v66_v1 = vld [vmem:[#allocation6 + $0x70] sm:$0xff]  ;;  %s206_s24 = smov [#allocation8]   ;;  %s107_s28 = sshll.u32 %s242_s3, 4  ;;  %s108_s28 = int_to_ptr.hbm [resolvable:$true] %s107_s28 }
   0xc   :  { %68 = vmatpush.xpose.msra.mxu0 %v67_v0  ;;  %v65_v2 = vld [vmem:[#allocation6 + $0x68] sm:$0xff]  ;;  %v64_v3 = vld [vmem:[#allocation6 + $0x60] sm:$0xff]  ;;  %v63_v4 = vld [vmem:[#allocation6 + $0x58] sm:$0xff]  ;;  %s105_s25 = sshll.u32 %s206_s24, 4  ;;  %s106_s25 = int_to_ptr.vmem [resolvable:$true] %s105_s25 }
   0xd   :  { %v62_v5 = vld [vmem:[#allocation6 + $0x50] sm:$0xff]  ;;  %v61_v6 = vld [vmem:[#allocation6 + $0x48] sm:$0xff]  ;;  %v60_v7 = vld [vmem:[#allocation6 + $0x40] sm:$0xff] }
   0xe   :  { %v59_v8 = vld [vmem:[#allocation6 + $0x38] sm:$0xff]  ;;  %v58_v9 = vld [vmem:[#allocation6 + $0x30] sm:$0xff]  ;;  %v57_v10 = vld [vmem:[#allocation6 + $0x28] sm:$0xff] }
   0xf   :  { %v56_v11 = vld [vmem:[#allocation6 + $0x20] sm:$0xff]  ;;  %v55_v12 = vld [vmem:[#allocation6 + $0x18] sm:$0xff]  ;;  %v54_v13 = vld [vmem:[#allocation6 + $0x10] sm:$0xff] }
  0x10   :  { %69 = vmatpush.xpose.msra.mxu0 %v66_v1  ;;  %v53_v14 = vld [vmem:[#allocation6 + $0x8] sm:$0xff]  ;;  %v52_v15 = vld [vmem:[#allocation6] sm:$0xff]  ;;  %v51_v16 = vld [vmem:[#allocation3] sm:$0xff] }
  0x11   :  { %v123_v17 = vld [vmem:[%s241_s2] ss:$0 sm:$0xff] }
  0x14   :  { %70 = vmatpush.xpose.msra.mxu0 %v65_v2 }
  0x18   :  { %71 = vmatpush.xpose.msra.mxu0 %v64_v3 }
  0x1c   :  { %72 = vmatpush.xpose.msra.mxu0 %v63_v4 }
  0x20   :  { %73 = vmatpush.xpose.msra.mxu0 %v62_v5 }
  0x24   :  { %74 = vmatpush.xpose.msra.mxu0 %v61_v6 }
  0x28   :  { %75 = vmatpush.xpose.msra.mxu0 %v60_v7 }
  0x2c   :  { %76 = vmatpush.xpose.msra.mxu0 %v59_v8 }
  0x30   :  { %77 = vmatpush.xpose.msra.mxu0 %v58_v9 }
  0x34   :  { %78 = vmatpush.xpose.msra.mxu0 %v57_v10 }
  0x38   :  { %79 = vmatpush.xpose.msra.mxu0 %v56_v11 }
  0x3c   :  { %80 = vmatpush.xpose.msra.mxu0 %v55_v12 }
  0x40   :  { %81 = vmatpush.xpose.msra.mxu0 %v54_v13 }
  0x44   :  { %82 = vmatpush.xpose.msra.mxu0 %v53_v14 }
  0x48   :  { %83 = vmatpush.xpose.msra.mxu0 %v52_v15 }
  0x4b   :  { %84 = vmatmul.f32.vlgmr.msra.gmra.mxu0 %v51_v16 }
  0xc8   :  { %v85_v18 = vpop.f32.mrf.mxu0 }
  0xc9   :  { %v98_v19 = vadd.f32 %v123_v17, %v85_v18 }
  0xcb   :  { %99 = vst [vmem:[#allocation8] sm:$0xff] %v98_v19 }
  0xcc   :  { %110 = dma.vmem_to_hbm [thread:$0]  %s106_s25, 128, %s108_s28, [#allocation5]  }
  0xcd   :  { %200 = dma.done.wait [#allocation5], 128  }
  0xce   :  { %201 = vsyncadd [#allocation5], 4294967168 }
  0xcf   :  { %115 = vsyncpa [#allocation4], 1 }
  0xd0   :  { %116 = vsyncpa [#allocation7], 1 }
  0xd1   :  { %117 = vsyncpa [#allocation5], 1 }

</bundles_post_ra>
